<compile_context>
chip_gen: v7x
topology: tpu7x:2x2x1
jax: 0.10.0
libtpu: 0.0.40
codegen_flags: <defaults>
</compile_context>

<pallas_src>
import functools

import jax
import jax.numpy as jnp
from jax import lax
from jax.experimental import pallas as pl
from jax.experimental.pallas import tpu as pltpu

HIDDEN = 256   # fixed by the module (fc1/fc2 out_features)
LANE = 128
K_ALIGN = 512  # K padding granularity (multiple of 128, friendly to bf16 tiles)


def _leaky_relu(x, slope=0.1):
    return jnp.where(x > 0, x, slope * x)


def _round_up(n, m):
    return ((n + m - 1) // m) * m


# ------------------------------ kernel ---------------------------------------

def _head_kernel(x_ref, w1_ref, b1_ref, w2_ref, b2_ref, wh_ref, bh_ref,
                 out_ref, acc_ref):
    k = pl.program_id(1)

    @pl.when(k == 0)
    def _():
        acc_ref[...] = jnp.zeros_like(acc_ref)

    # fc1 partial sum over this K tile: (block_b, block_k) x (block_k, 256).
    # .astype(bf16) is a no-op if the caller already feeds bf16 activations.
    acc_ref[...] += jnp.dot(x_ref[...].astype(jnp.bfloat16), w1_ref[...],
                            preferred_element_type=jnp.float32)

    @pl.when(k == pl.num_programs(1) - 1)
    def _():
        h = _leaky_relu(acc_ref[...] + b1_ref[...])                         # fc1 epilogue
        h = _leaky_relu(jnp.dot(h.astype(jnp.bfloat16), w2_ref[...],
                                preferred_element_type=jnp.float32)
                        + b2_ref[...])                                      # fc2
        out_ref[...] = (jnp.dot(h.astype(jnp.bfloat16), wh_ref[...],
                                preferred_element_type=jnp.float32)
                        + bh_ref[...]).astype(out_ref.dtype)                # fused trans+rot


# ------------------------------ setup ----------------------------------------

def prepare_params(params, *, block_k=4096):
    """One-time parameter prep (do NOT call per forward):
       - transpose to K-major / N-major contiguous layouts,
       - cast weights to bf16,
       - zero-pad w1 along K to a block_k multiple (keeps the K pipeline for
         any in_features, no giant single-block fallback),
       - fuse fc_trans/fc_rot into one head matmul and pad its output width
         to a lane-dense multiple of 128."""
    f_in = params["w1"].shape[1]
    bk = min(block_k, _round_up(f_in, K_ALIGN))
    f_pad = _round_up(_round_up(f_in, K_ALIGN), bk)

    w1t = jnp.pad(params["w1"].T.astype(jnp.bfloat16),
                  ((0, f_pad - f_in), (0, 0)))                  # (F_pad, 256) K-major
    w2t = params["w2"].T.astype(jnp.bfloat16)                   # (256, 256)

    wh = jnp.concatenate([params["wt"], params["wr"]], axis=0)  # (7*num_obj, 256)
    bh = jnp.concatenate([params["bt"], params["br"]], axis=0)  # (7*num_obj,)
    n_head = wh.shape[0]
    n_head_pad = max(LANE, _round_up(n_head, LANE))
    wht = jnp.pad(wh.T.astype(jnp.bfloat16),
                  ((0, 0), (0, n_head_pad - n_head)))           # (256, n_head_pad)
    bhp = jnp.pad(bh.astype(jnp.float32),
                  (0, n_head_pad - n_head))[None, :]            # (1, n_head_pad)

    return {
        "w1t": w1t,
        "b1": params["b1"].astype(jnp.float32)[None, :],        # (1, 256)
        "w2t": w2t,
        "b2": params["b2"].astype(jnp.float32)[None, :],        # (1, 256)
        "wht": wht,
        "bh": bhp,
    }


def _choose_block_k(f_pad, requested):
    bk = min(requested, f_pad)
    if f_pad % bk == 0:
        return bk
    for cand in range(bk - bk % K_ALIGN, 0, -K_ALIGN):
        if f_pad % cand == 0:
            return cand
    return f_pad


# ------------------------------ wrapper ---------------------------------------

def prediction_head_pallas(x, obj, prep, *, num_obj, block_k=4096, block_b=128):
    """x: (B, C, H, W); obj: (B,) int32; prep: output of prepare_params.
    All static sizes are derived from (traced) array *shapes*, so this is
    safe to call under jit with prep passed as a pytree of arrays."""
    B = x.shape[0]
    x_flat = x.reshape(B, -1)                       # keep incoming dtype (bf16 ok)
    f_in = x_flat.shape[1]
    f_pad = prep["w1t"].shape[0]
    n_head_pad = prep["wht"].shape[1]
    n_head = 7 * num_obj

    if f_pad != f_in:
        # zero K-padding: padded w1 rows are also zero, contributes nothing.
        x_flat = jnp.pad(x_flat, ((0, 0), (0, f_pad - f_in)))

    bk = _choose_block_k(f_pad, block_k)
    kt = f_pad // bk

    bb = min(block_b, B)
    if B % bb != 0:
        bb = B                                       # single (full) batch tile
    bt = B // bb

    w1t, b1 = prep["w1t"], prep["b1"]
    w2t, b2 = prep["w2t"], prep["b2"]
    wht, bh = prep["wht"], prep["bh"]

    cost = pl.CostEstimate(
        flops=2 * B * (f_pad * HIDDEN + HIDDEN * HIDDEN + HIDDEN * n_head_pad),
        transcendentals=0,
        bytes_accessed=(x_flat.size * x_flat.dtype.itemsize
                        + w1t.size * 2 + w2t.size * 2 + wht.size * 2
                        + (b1.size + b2.size + bh.size) * 4
                        + B * n_head_pad * 4),
    )

    out = pl.pallas_call(
        _head_kernel,
        out_shape=jax.ShapeDtypeStruct((B, n_head_pad), jnp.float32),
        grid_spec=pltpu.PrefetchScalarGridSpec(
            num_scalar_prefetch=0,
            grid=(bt, kt),                                        # (batch, K)
            in_specs=[
                pl.BlockSpec((bb, bk), lambda b, k: (b, k)),      # x tile
                pl.BlockSpec((bk, HIDDEN), lambda b, k: (k, 0)),  # w1 K-major tile
                pl.BlockSpec(b1.shape, lambda b, k: (0, 0)),      # resident
                pl.BlockSpec(w2t.shape, lambda b, k: (0, 0)),     # resident
                pl.BlockSpec(b2.shape, lambda b, k: (0, 0)),      # resident
                pl.BlockSpec(wht.shape, lambda b, k: (0, 0)),     # resident
                pl.BlockSpec(bh.shape, lambda b, k: (0, 0)),      # resident
            ],
            out_specs=pl.BlockSpec((bb, n_head_pad), lambda b, k: (b, 0)),
            scratch_shapes=[pltpu.VMEM((bb, HIDDEN), jnp.float32)],  # fc1 acc
        ),
        compiler_params=pltpu.CompilerParams(
            # batch axis can shard across v7x's 2 TensorCores; K is a reduction.
            dimension_semantics=("parallel", "arbitrary")),
        cost_estimate=cost,
    )(x_flat, w1t, b1, w2t, b2, wht, bh)

    # view(-1, num_obj, {3,4}) + batched_index_select(dim=1) + squeeze(1)
    # (tiny gather; fused into the surrounding jit rather than the kernel)
    obj = obj.astype(jnp.int32)
    t = out[:, :3 * num_obj].reshape(B, num_obj, 3)
    r = out[:, 3 * num_obj:n_head].reshape(B, num_obj, 4)
    t_sel = jnp.take_along_axis(t, obj[:, None, None], axis=1)[:, 0, :]   # (B, 3)
    r_sel = jnp.take_along_axis(r, obj[:, None, None], axis=1)[:, 0, :]   # (B, 4)
    return t_sel, r_sel


# ----------------------------- references -------------------------------------

def _reference_f32(x, obj, params, num_obj):
    """Pure f32 reference of the PyTorch forward."""
    B = x.shape[0]
    h = x.reshape(B, -1).astype(jnp.float32)
    h = _leaky_relu(h @ params["w1"].T + params["b1"])
    h = _leaky_relu(h @ params["w2"].T + params["b2"])
    t = (h @ params["wt"].T + params["bt"]).reshape(B, num_obj, 3)
    r = (h @ params["wr"].T + params["br"]).reshape(B, num_obj, 4)
    obj = obj.astype(jnp.int32)
    t = jnp.take_along_axis(t, obj[:, None, None], axis=1)[:, 0, :]
    r = jnp.take_along_axis(r, obj[:, None, None], axis=1)[:, 0, :]
    return t, r


def _reference_matched(x, obj, prep, num_obj):
    """Reference with the same bf16 weight/activation quantization as the kernel."""
    B = x.shape[0]
    xf = x.reshape(B, -1)
    f_in = xf.shape[1]
    f_pad = prep["w1t"].shape[0]
    xp = jnp.pad(xf, ((0, 0), (0, f_pad - f_in))).astype(jnp.bfloat16)
    h = _leaky_relu(jnp.dot(xp, prep["w1t"], preferred_element_type=jnp.float32)
                    + prep["b1"])
    h = _leaky_relu(jnp.dot(h.astype(jnp.bfloat16), prep["w2t"],
                            preferred_element_type=jnp.float32) + prep["b2"])
    o = (jnp.dot(h.astype(jnp.bfloat16), prep["wht"],
                 preferred_element_type=jnp.float32) + prep["bh"])
    n_head = 7 * num_obj
    obj = obj.astype(jnp.int32)
    t = o[:, :3 * num_obj].reshape(B, num_obj, 3)
    r = o[:, 3 * num_obj:n_head].reshape(B, num_obj, 4)
    t = jnp.take_along_axis(t, obj[:, None, None], axis=1)[:, 0, :]
    r = jnp.take_along_axis(r, obj[:, None, None], axis=1)[:, 0, :]
    return t, r


if __name__ == "__main__":
    # Small, forward-consistent shapes: flatten(2,4,16,16) -> in_features=1024.
    B, C, H, W = 2, 4, 16, 16
    in_features = C * H * W
    num_obj = 5

    key = jax.random.PRNGKey(0)
    keys = jax.random.split(key, 10)

    params = {
        "w1": jax.random.normal(keys[0], (HIDDEN, in_features), jnp.float32) * 0.02,
        "b1": jax.random.normal(keys[1], (HIDDEN,), jnp.float32) * 0.01,
        "w2": jax.random.normal(keys[2], (HIDDEN, HIDDEN), jnp.float32) * 0.02,
        "b2": jax.random.normal(keys[3], (HIDDEN,), jnp.float32) * 0.01,
        "wt": jax.random.normal(keys[4], (3 * num_obj, HIDDEN), jnp.float32) * 0.02,
        "bt": jax.random.normal(keys[5], (3 * num_obj,), jnp.float32) * 0.01,
        "wr": jax.random.normal(keys[6], (4 * num_obj, HIDDEN), jnp.float32) * 0.02,
        "br": jax.random.normal(keys[7], (4 * num_obj,), jnp.float32) * 0.01,
    }

    x = jax.random.normal(keys[8], (B, C, H, W), jnp.float32)
    obj = jax.random.randint(keys[9], (B,), 0, num_obj, jnp.int32)

    # One-time setup: K-major/bf16 weights, K padding, fused + lane-padded head.
    BLOCK_K = 4096   # sweep 2048-8192; fits v5e's 16 MiB scoped-VMEM default.
    prep = prepare_params(params, block_k=BLOCK_K)

    head_fn = jax.jit(functools.partial(prediction_head_pallas,
                                        num_obj=num_obj, block_k=BLOCK_K))
    t, r = jax.block_until_ready(head_fn(x, obj, prep))

    assert t.shape == (B, 3) and r.shape == (B, 4)

    # Tight check vs. a reference with identical bf16 quantization.
    t_m, r_m = _reference_matched(x, obj, prep, num_obj)
    assert jnp.allclose(t, t_m, atol=2e-3, rtol=2e-3), float(jnp.max(jnp.abs(t - t_m)))
    assert jnp.allclose(r, r_m, atol=2e-3, rtol=2e-3), float(jnp.max(jnp.abs(r - r_m)))

    # Loose check vs. the full-f32 module semantics (bf16 weights loosen tol).
    t_f, r_f = _reference_f32(x, obj, params, num_obj)
    assert jnp.allclose(t, t_f, atol=3e-2, rtol=3e-2), float(jnp.max(jnp.abs(t - t_f)))
    assert jnp.allclose(r, r_f, atol=3e-2, rtol=3e-2), float(jnp.max(jnp.abs(r - r_f)))

    print("KERNEL_OK")
</pallas_src>

<mosaic_0001>
module attributes {stable_mosaic.version = 11 : i64} {
  func.func @_head_kernel(%arg0: i32, %arg1: i32, %arg2: memref<2x1024xf32, #tpu.memory_space<vmem>>, %arg3: memref<1024x256xbf16, #tpu.memory_space<vmem>>, %arg4: memref<1x256xf32, #tpu.memory_space<vmem>>, %arg5: memref<256x256xbf16, #tpu.memory_space<vmem>>, %arg6: memref<1x256xf32, #tpu.memory_space<vmem>>, %arg7: memref<256x128xbf16, #tpu.memory_space<vmem>>, %arg8: memref<1x128xf32, #tpu.memory_space<vmem>>, %arg9: memref<2x128xf32, #tpu.memory_space<vmem>>, %arg10: memref<2x256xf32, #tpu.memory_space<vmem>>) attributes {dimension_semantics = [#tpu.dimension_semantics<parallel>, #tpu.dimension_semantics<arbitrary>], iteration_bounds = array<i64: 1, 1>, scalar_prefetch = 0 : i64, scratch_operands = 1 : i64, tpu.core_type = #tpu.core_type<tc>, window_params = [{transform_indices = @transform_0, window_bounds = array<i64: 2, 1024>}, {transform_indices = @transform_1, window_bounds = array<i64: 1024, 256>}, {pipeline_mode = #tpu.pipeline_mode<synchronous>, transform_indices = @transform_2, window_bounds = array<i64: 1, 256>}, {pipeline_mode = #tpu.pipeline_mode<synchronous>, transform_indices = @transform_3, window_bounds = array<i64: 256, 256>}, {pipeline_mode = #tpu.pipeline_mode<synchronous>, transform_indices = @transform_4, window_bounds = array<i64: 1, 256>}, {pipeline_mode = #tpu.pipeline_mode<synchronous>, transform_indices = @transform_5, window_bounds = array<i64: 256, 128>}, {pipeline_mode = #tpu.pipeline_mode<synchronous>, transform_indices = @transform_6, window_bounds = array<i64: 1, 128>}, {transform_indices = @transform_7, window_bounds = array<i64: 2, 128>}]} {
    %c0_i32 = arith.constant 0 : i32
    %0 = arith.cmpi eq, %arg1, %c0_i32 : i32
    %1 = arith.extui %0 : i1 to i32
    %c0_i32_0 = arith.constant 0 : i32
    %2 = arith.cmpi ne, %1, %c0_i32_0 : i32
    scf.if %2 {
      %cst_10 = arith.constant 0.000000e+00 : f32
      %13 = vector.broadcast %cst_10 : f32 to vector<2x256xf32>
      %c0_11 = arith.constant 0 : index
      %c0_12 = arith.constant 0 : index
      %14 = vector.load %arg10[%c0_11, %c0_12] : memref<2x256xf32, #tpu.memory_space<vmem>>, vector<2x256xf32>
      tpu.vector_store %arg10[%c0_11, %c0_12], %13 {strides = array<i32>} : memref<2x256xf32, #tpu.memory_space<vmem>>, vector<2x256xf32>,
    } else {
    }
    %c0 = arith.constant 0 : index
    %c0_1 = arith.constant 0 : index
    %3 = vector.load %arg10[%c0, %c0_1] : memref<2x256xf32, #tpu.memory_space<vmem>>, vector<2x256xf32>
    %c0_2 = arith.constant 0 : index
    %c0_3 = arith.constant 0 : index
    %4 = vector.load %arg2[%c0_2, %c0_3] : memref<2x1024xf32, #tpu.memory_space<vmem>>, vector<2x1024xf32>
    %5 = arith.truncf %4 : vector<2x1024xf32> to vector<2x1024xbf16>
    %c0_4 = arith.constant 0 : index
    %c0_5 = arith.constant 0 : index
    %6 = vector.load %arg3[%c0_4, %c0_5] : memref<1024x256xbf16, #tpu.memory_space<vmem>>, vector<1024x256xbf16>
    %cst = arith.constant dense<0.000000e+00> : vector<2x256xf32>
    %7 = tpu.matmul %5, %6, %cst {dimension_numbers = #tpu.dot_dimension_numbers<[1], [0], [0], [1], [0, 0, 1, 1], [], []>} : vector<2x1024xbf16>, vector<1024x256xbf16>, vector<2x256xf32> -> vector<2x256xf32>
    %8 = arith.addf %3, %7 : vector<2x256xf32>
    %c0_6 = arith.constant 0 : index
    %c0_7 = arith.constant 0 : index
    %9 = vector.load %arg10[%c0_6, %c0_7] : memref<2x256xf32, #tpu.memory_space<vmem>>, vector<2x256xf32>
    tpu.vector_store %arg10[%c0_6, %c0_7], %8 {strides = array<i32>} : memref<2x256xf32, #tpu.memory_space<vmem>>, vector<2x256xf32>,
    %c0_i32_8 = arith.constant 0 : i32
    %10 = arith.cmpi eq, %arg1, %c0_i32_8 : i32
    %11 = arith.extui %10 : i1 to i32
    %c0_i32_9 = arith.constant 0 : i32
    %12 = arith.cmpi ne, %11, %c0_i32_9 : i32
    scf.if %12 {
      %c0_10 = arith.constant 0 : index
      %c0_11 = arith.constant 0 : index
      %13 = vector.load %arg10[%c0_10, %c0_11] : memref<2x256xf32, #tpu.memory_space<vmem>>, vector<2x256xf32>
      %c0_12 = arith.constant 0 : index
      %c0_13 = arith.constant 0 : index
      %14 = vector.load %arg4[%c0_12, %c0_13] : memref<1x256xf32, #tpu.memory_space<vmem>>, vector<1x256xf32>
      %15 = vector.broadcast %14 : vector<1x256xf32> to vector<2x256xf32>
      %16 = arith.addf %13, %15 : vector<2x256xf32>
      %cst_14 = arith.constant 0.000000e+00 : f32
      %17 = vector.broadcast %cst_14 : f32 to vector<2x256xf32>
      %18 = arith.cmpf ogt, %16, %17 : vector<2x256xf32>
      %cst_15 = arith.constant 1.000000e-01 : f32
      %19 = vector.broadcast %cst_15 : f32 to vector<2x256xf32>
      %20 = arith.mulf %19, %16 : vector<2x256xf32>
      %21 = arith.select %18, %16, %20 : vector<2x256xi1>, vector<2x256xf32>
      %22 = arith.truncf %21 : vector<2x256xf32> to vector<2x256xbf16>
      %c0_16 = arith.constant 0 : index
      %c0_17 = arith.constant 0 : index
      %23 = vector.load %arg5[%c0_16, %c0_17] : memref<256x256xbf16, #tpu.memory_space<vmem>>, vector<256x256xbf16>
      %cst_18 = arith.constant dense<0.000000e+00> : vector<2x256xf32>
      %24 = tpu.matmul %22, %23, %cst_18 {dimension_numbers = #tpu.dot_dimension_numbers<[1], [0], [0], [1], [0, 0, 1, 1], [], []>} : vector<2x256xbf16>, vector<256x256xbf16>, vector<2x256xf32> -> vector<2x256xf32>
      %c0_19 = arith.constant 0 : index
      %c0_20 = arith.constant 0 : index
      %25 = vector.load %arg6[%c0_19, %c0_20] : memref<1x256xf32, #tpu.memory_space<vmem>>, vector<1x256xf32>
      %26 = vector.broadcast %25 : vector<1x256xf32> to vector<2x256xf32>
      %27 = arith.addf %24, %26 : vector<2x256xf32>
      %cst_21 = arith.constant 0.000000e+00 : f32
      %28 = vector.broadcast %cst_21 : f32 to vector<2x256xf32>
      %29 = arith.cmpf ogt, %27, %28 : vector<2x256xf32>
      %cst_22 = arith.constant 1.000000e-01 : f32
      %30 = vector.broadcast %cst_22 : f32 to vector<2x256xf32>
      %31 = arith.mulf %30, %27 : vector<2x256xf32>
      %32 = arith.select %29, %27, %31 : vector<2x256xi1>, vector<2x256xf32>
      %33 = arith.truncf %32 : vector<2x256xf32> to vector<2x256xbf16>
      %c0_23 = arith.constant 0 : index
      %c0_24 = arith.constant 0 : index
      %34 = vector.load %arg7[%c0_23, %c0_24] : memref<256x128xbf16, #tpu.memory_space<vmem>>, vector<256x128xbf16>
      %cst_25 = arith.constant dense<0.000000e+00> : vector<2x128xf32>
      %35 = tpu.matmul %33, %34, %cst_25 {dimension_numbers = #tpu.dot_dimension_numbers<[1], [0], [0], [1], [0, 0, 1, 1], [], []>} : vector<2x256xbf16>, vector<256x128xbf16>, vector<2x128xf32> -> vector<2x128xf32>
      %c0_26 = arith.constant 0 : index
      %c0_27 = arith.constant 0 : index
      %36 = vector.load %arg8[%c0_26, %c0_27] : memref<1x128xf32, #tpu.memory_space<vmem>>, vector<1x128xf32>
      %37 = vector.broadcast %36 : vector<1x128xf32> to vector<2x128xf32>
      %38 = arith.addf %35, %37 : vector<2x128xf32>
      %c0_28 = arith.constant 0 : index
      %c0_29 = arith.constant 0 : index
      %39 = vector.load %arg9[%c0_28, %c0_29] : memref<2x128xf32, #tpu.memory_space<vmem>>, vector<2x128xf32>
      tpu.vector_store %arg9[%c0_28, %c0_29], %38 {strides = array<i32>} : memref<2x128xf32, #tpu.memory_space<vmem>>, vector<2x128xf32>,
    } else {
    }
    return
  }
  func.func @transform_0(%arg0: i32, %arg1: i32) -> (i32, i32) {
    %c0_i32 = arith.constant 0 : i32
    return %arg0, %arg1 : i32, i32
  }
  func.func @transform_1(%arg0: i32, %arg1: i32) -> (i32, i32) {
    %c0_i32 = arith.constant 0 : i32
    %c0_i32_0 = arith.constant 0 : i32
    return %arg1, %c0_i32 : i32, i32
  }
  func.func @transform_2(%arg0: i32, %arg1: i32) -> (i32, i32) {
    %c0_i32 = arith.constant 0 : i32
    %c0_i32_0 = arith.constant 0 : i32
    %c0_i32_1 = arith.constant 0 : i32
    return %c0_i32, %c0_i32_0 : i32, i32
  }
  func.func @transform_3(%arg0: i32, %arg1: i32) -> (i32, i32) {
    %c0_i32 = arith.constant 0 : i32
    %c0_i32_0 = arith.constant 0 : i32
    %c0_i32_1 = arith.constant 0 : i32
    return %c0_i32, %c0_i32_0 : i32, i32
  }
  func.func @transform_4(%arg0: i32, %arg1: i32) -> (i32, i32) {
    %c0_i32 = arith.constant 0 : i32
    %c0_i32_0 = arith.constant 0 : i32
    %c0_i32_1 = arith.constant 0 : i32
    return %c0_i32, %c0_i32_0 : i32, i32
  }
  func.func @transform_5(%arg0: i32, %arg1: i32) -> (i32, i32) {
    %c0_i32 = arith.constant 0 : i32
    %c0_i32_0 = arith.constant 0 : i32
    %c0_i32_1 = arith.constant 0 : i32
    return %c0_i32, %c0_i32_0 : i32, i32
  }
  func.func @transform_6(%arg0: i32, %arg1: i32) -> (i32, i32) {
    %c0_i32 = arith.constant 0 : i32
    %c0_i32_0 = arith.constant 0 : i32
    %c0_i32_1 = arith.constant 0 : i32
    return %c0_i32, %c0_i32_0 : i32, i32
  }
  func.func @transform_7(%arg0: i32, %arg1: i32) -> (i32, i32) {
    %c0_i32 = arith.constant 0 : i32
    %c0_i32_0 = arith.constant 0 : i32
    return %arg0, %c0_i32 : i32, i32
  }
}

</mosaic_0001>

<bundles_post_ra>
// kernel: prediction_head_pallas.1
= control target key start
LH: loop header
LB: loop body
LE: loop exit
PB: predicated region body
PF: predicated region fallthrough
CT: control target
= control target key end

     0   :  { %12 = vsyncpa [#allocation4], 0  ;;  %s2235_s0 = inlined_call_operand.vmem [shape: f32[2,1024], index: 0, kind: input, shape index: {}]   ;;  %s2236_s1 = inlined_call_operand.hbm [shape: bf16[1024,256], index: 1, kind: input, shape index: {}]   ;;  %s2237_s2 = inlined_call_operand.vmem [shape: f32[1,256], index: 2, kind: input, shape index: {}]   ;;  %s2238_s3 = inlined_call_operand.hbm [shape: bf16[256,256], index: 3, kind: input, shape index: {}]   ;;  %s2239_s4 = inlined_call_operand.vmem [shape: f32[1,256], index: 4, kind: input, shape index: {}]   ;;  %s2240_s5 = inlined_call_operand.vmem [shape: bf16[256,128], index: 5, kind: input, shape index: {}]   ;;  %s2241_s6 = inlined_call_operand.vmem [shape: f32[1,128], index: 6, kind: input, shape index: {}]   ;;  %s2242_s7 = inlined_call_operand.vmem [shape: f32[2,128], index: 7, kind: output, shape index: {}]  }
   0x1   :  { %13 = vsyncpa [#allocation6], 0  ;;  %s2056_s24 = smov [#allocation3]   ;;  %s2008_s28 = scalar_lea.hbm %s2236_s1, 16384 }
   0x2   :  { %s21_s25 = sshll.u32 %s2056_s24, 4  ;;  %p2009_p0 = scmp.ne.s32.totalorder %s2236_s1, %s2008_s28  ;;  %s22_s25 = int_to_ptr.vmem [resolvable:$true] %s21_s25 }
   0x3   :  { %p2012_p1 = scmp.lt.u32.totalorder %s2008_s28, %s2236_s1 }
   0x5   :  { %p2014_p2 = pnand %p2012_p1, %p2009_p0 }
   0x7   :  { %2017 = shalt.err (!%p2014_p2)
}
   0x8   :  { %s2018_s10 = scalar_lea.vmem %s22_s25, 16384  ;;  %p2023_p4 = scmp.lt.s32.totalorder %s22_s25, %s22_s25 }
   0x9   :  { %p2019_p3 = scmp.ne.s32.totalorder %s22_s25, %s2018_s10  ;;  %p2024_p5 = scmp.lt.s32.totalorder %s2018_s10, %s2018_s10 }
   0xb   :  { %p2025_p6 = por %p2024_p5, %p2023_p4 }
   0xd   :  { %p2026_p7 = pnand %p2025_p6, %p2019_p3 }
   0xf   :  { %2029 = shalt.err (!%p2026_p7)
}
  0x10   :  { %s2057_s11 = smov 128   ;;  %s2058_s12 = smov 8  }
  0x11   :  { %27 = dma.hbm_to_vmem [thread:$0]  %s2236_s1, 16384, %s22_s25, [#allocation4], %s2057_s11, %s2057_s11, %s2058_s12  }
  0x12   :  { %s2059_s15 = smov [#allocation5]   ;;  %s2030_s19 = scalar_lea.hbm %s2238_s3, 4096 }
  0x13   :  { %s35_s16 = sshll.u32 %s2059_s15, 4  ;;  %p2031_p8 = scmp.ne.s32.totalorder %s2238_s3, %s2030_s19  ;;  %s36_s16 = int_to_ptr.vmem [resolvable:$true] %s35_s16 }
  0x14   :  { %p2034_p9 = scmp.lt.u32.totalorder %s2030_s19, %s2238_s3 }
  0x16   :  { %p2036_p10 = pnand %p2034_p9, %p2031_p8 }
  0x18   :  { %2039 = shalt.err (!%p2036_p10)
}
  0x19   :  { %s2040_s24 = scalar_lea.vmem %s36_s16, 4096  ;;  %p2045_p12 = scmp.lt.s32.totalorder %s36_s16, %s36_s16 }
  0x1a   :  { %p2041_p11 = scmp.ne.s32.totalorder %s36_s16, %s2040_s24  ;;  %p2046_p13 = scmp.lt.s32.totalorder %s2040_s24, %s2040_s24 }
  0x1c   :  { %p2047_p0 = por %p2046_p13, %p2045_p12 }
  0x1e   :  { %p2048_p1 = pnand %p2047_p0, %p2041_p11 }
  0x20   :  { %2051 = shalt.err (!%p2048_p1)
}
  0x21   :  { %41 = dma.hbm_to_vmem [thread:$0]  %s2238_s3, 4096, %s36_s16, [#allocation6], %s2057_s11, %s2057_s11, %s2058_s12  }
  0x22   :  { %2052 = dma.done.wait [#allocation4], 16384  }
  0x23   :  { %2053 = vsyncadd [#allocation4], 4294950912 }
  0x24   :  { %2054 = dma.done.wait [#allocation6], 4096  }
  0x25   :  { %2055 = vsyncadd [#allocation6], 4294963200  ;;  %v1750_v0 = vld [vmem:[#allocation3 + $0x104] ss:$8 sps:$4 sm:$0xff]   ;;  %v1752_v1 = vld [vmem:[#allocation3 + $0x100] ss:$8 sps:$4 sm:$0xff]   ;;  %v69_v11 = vlaneseq }
  0x26   :  { %924 = vmatprep.subr.bf16.mxu0 %v1750_v0  ;;  %v1753_v2 = vld [vmem:[#allocation3 + $0x114] ss:$8 sps:$4 sm:$0xff]   ;;  %v1755_v3 = vld [vmem:[#allocation3 + $0x110] ss:$8 sps:$4 sm:$0xff]   ;;  %v1756_v4 = vld [vmem:[#allocation3 + $0x124] ss:$8 sps:$4 sm:$0xff]  }
  0x27   :  { %925 = vmatpush1.bf16.msra.mxu0 %v1752_v1  ;;  %v1758_v5 = vld [vmem:[#allocation3 + $0x120] ss:$8 sps:$4 sm:$0xff]   ;;  %v1759_v6 = vld [vmem:[#allocation3 + $0x134] ss:$8 sps:$4 sm:$0xff]   ;;  %v1761_v7 = vld [vmem:[#allocation3 + $0x130] ss:$8 sps:$4 sm:$0xff]  }
  0x28   :  { %926 = vmatprep.subr.bf16.mxu0 %v1753_v2  ;;  %v1762_v8 = vld [vmem:[#allocation3 + $0x144] ss:$8 sps:$4 sm:$0xff]   ;;  %v2060_v9 = vmov 1983009808   ;;  %v1764_v12 = vld [vmem:[#allocation3 + $0x140] ss:$8 sps:$4 sm:$0xff]  }
  0x29   :  { %v67_v10 = vunpack.c.l.s4 %v2060_v9  ;;  %v1765_v13 = vld [vmem:[#allocation3 + $0x154] ss:$8 sps:$4 sm:$0xff]   ;;  %v2126_v15 = vshrl.u32 %v69_v11, 7  ;;  %v1767_v16 = vld [vmem:[#allocation3 + $0x150] ss:$8 sps:$4 sm:$0xff]   ;;  %v2142_v46 = vld [vmem:[%s2235_s0 + $0x8] sm:$0xff] }
  0x2a   :  { %v1768_v17 = vld [vmem:[#allocation3 + $0x164] ss:$8 sps:$4 sm:$0xff]   ;;  %v61_v19 = vld [vmem:[%s2235_s0] sm:$0xff]  ;;  %v1773_v25 = vld [vmem:[#allocation3 + $0x170] ss:$8 sps:$4 sm:$0xff]  }
  0x2b   :  { %927 = vmatpush1.bf16.msra.mxu0 %v1755_v3  ;;  %v68_v14 = vunpack.c.0.s8 %v67_v10  ;;  %v65_v20 = vcombine.high %v61_v19, %v61_v19  ;;  %v1770_v21 = vld [vmem:[#allocation3 + $0x160] ss:$8 sps:$4 sm:$0xff]   ;;  %v1771_v22 = vld [vmem:[#allocation3 + $0x174] ss:$8 sps:$4 sm:$0xff]   ;;  %v1774_v26 = vld [vmem:[#allocation3 + $0x184] ss:$8 sps:$4 sm:$0xff]  }
  0x2c   :  { %928 = vmatprep.subr.bf16.mxu0 %v1756_v4  ;;  %v1776_v28 = vld [vmem:[#allocation3 + $0x180] ss:$8 sps:$4 sm:$0xff]   ;;  %v1777_v29 = vld [vmem:[#allocation3 + $0x194] ss:$8 sps:$4 sm:$0xff]   ;;  %v1779_v30 = vld [vmem:[#allocation3 + $0x190] ss:$8 sps:$4 sm:$0xff]  }
  0x2d   :  { %v2129_v18 = vsub.s32 %v68_v14, %v2126_v15  ;;  %v1780_v31 = vld [vmem:[#allocation3 + $0x1a4] ss:$8 sps:$4 sm:$0xff]   ;;  %v1782_v32 = vld [vmem:[#allocation3 + $0x1a0] ss:$8 sps:$4 sm:$0xff]   ;;  %v1783_v33 = vld [vmem:[#allocation3 + $0x1b4] ss:$8 sps:$4 sm:$0xff]  }
  0x2e   :  { %v1785_v34 = vld [vmem:[#allocation3 + $0x1b0] ss:$8 sps:$4 sm:$0xff]   ;;  %v1847_v35 = vld [vmem:[#allocation3 + $0x4] ss:$8 sps:$4 sm:$0xff]   ;;  %v1849_v37 = vld [vmem:[#allocation3] ss:$8 sps:$4 sm:$0xff]  }
  0x2f   :  { %929 = vmatpush1.bf16.msra.mxu0 %v1758_v5  ;;  %v2135_v23 = vrot.slane %v65_v20, %v2129_v18  ;;  %v1786_v36 = vld [vmem:[#allocation3 + $0x1c4] ss:$8 sps:$4 sm:$0xff]   ;;  %v1788_v38 = vld [vmem:[#allocation3 + $0x1c0] ss:$8 sps:$4 sm:$0xff]   ;;  %883 = vmatprep.subr.bf16.mxu1 %v1847_v35  ;;  %v1853_v39 = vld [vmem:[#allocation3 + $0x14] ss:$8 sps:$4 sm:$0xff]   ;;  %v2146_v50 = vrot.slane %v2142_v46, %v2129_v18  ;;  %v2149_v53 = vrot.slane %v61_v19, %v2129_v18 }
  0x30   :  { %930 = vmatprep.subr.bf16.mxu0 %v1759_v6  ;;  %884 = vmatpush1.bf16.msra.mxu1 %v1849_v37  ;;  %v1855_v40 = vld [vmem:[#allocation3 + $0x10] ss:$8 sps:$4 sm:$0xff]   ;;  %v1789_v41 = vld [vmem:[#allocation3 + $0x1d4] ss:$8 sps:$4 sm:$0xff]   ;;  %v1859_v43 = vld [vmem:[#allocation3 + $0x24] ss:$8 sps:$4 sm:$0xff]  }
  0x31   :  { %v81_v24 = vcombine.high %v2135_v23, %v2135_v23  ;;  %885 = vmatprep.subr.bf16.mxu1 %v1853_v39  ;;  %v1791_v42 = vld [vmem:[#allocation3 + $0x1d0] ss:$8 sps:$4 sm:$0xff]   ;;  %v1861_v44 = vld [vmem:[#allocation3 + $0x20] ss:$8 sps:$4 sm:$0xff]   ;;  %v1792_v45 = vld [vmem:[#allocation3 + $0x1e4] ss:$8 sps:$4 sm:$0xff]   ;;  %v80_v56 = vcombine.high %v2149_v53, %v2149_v53  ;;  %v97_v57 = vcombine.high %v2146_v50, %v2146_v50  ;;  %v109_v61 = vpack.c.bf16 %v2135_v23, %v2135_v23 }
  0x32   :  { %v1865_v47 = vld [vmem:[#allocation3 + $0x34] ss:$8 sps:$4 sm:$0xff]   ;;  %v1794_v48 = vld [vmem:[#allocation3 + $0x1e0] ss:$8 sps:$4 sm:$0xff]   ;;  %v1867_v49 = vld [vmem:[#allocation3 + $0x30] ss:$8 sps:$4 sm:$0xff]  }
  0x33   :  { %931 = vmatpush1.bf16.msra.mxu0 %v1761_v7  ;;  %v110_v27 = vpack.c.bf16 %v81_v24, %v81_v24  ;;  %v1871_v51 = vld [vmem:[#allocation3 + $0x44] ss:$8 sps:$4 sm:$0xff]   ;;  %v1795_v52 = vld [vmem:[#allocation3 + $0x1f4] ss:$8 sps:$4 sm:$0xff]   ;;  %v1797_v54 = vld [vmem:[#allocation3 + $0x1f0] ss:$8 sps:$4 sm:$0xff]   ;;  %v108_v60 = vpack.c.bf16 %v80_v56, %v80_v56  ;;  %v112_v0 = vpack.c.bf16 %v97_v57, %v97_v57 }
  0x34   :  { %932 = vmatprep.subr.bf16.mxu0 %v1762_v8  ;;  %886 = vmatpush1.bf16.msra.mxu1 %v1855_v40  ;;  %v1873_v55 = vld [vmem:[#allocation3 + $0x40] ss:$8 sps:$4 sm:$0xff]   ;;  %v1877_v58 = vld [vmem:[#allocation3 + $0x54] ss:$8 sps:$4 sm:$0xff]   ;;  %v1801_v59 = vld [vmem:[#allocation3 + $0x204] ss:$8 sps:$4 sm:$0xff]  }
  0x35   :  { %956 = vmatprep.mubr.bf16.mxu0 %v110_v27  ;;  %887 = vmatprep.subr.bf16.mxu1 %v1859_v43  ;;  %v1879_v62 = vld [vmem:[#allocation3 + $0x50] ss:$8 sps:$4 sm:$0xff]   ;;  %v1799_v63 = vld [vmem:[#allocation3 + $0x200] ss:$8 sps:$4 sm:$0xff]   ;;  %v1804_v1 = vld [vmem:[#allocation3 + $0x214] ss:$8 sps:$4 sm:$0xff]  }
  0x36   :  { %915 = vmatprep.mubr.bf16.mxu1 %v108_v60  ;;  %v1883_v2 = vld [vmem:[#allocation3 + $0x64] ss:$8 sps:$4 sm:$0xff]   ;;  %v1802_v3 = vld [vmem:[#allocation3 + $0x210] ss:$8 sps:$4 sm:$0xff]   ;;  %v1885_v4 = vld [vmem:[#allocation3 + $0x60] ss:$8 sps:$4 sm:$0xff]  }
  0x37   :  { %933 = vmatpush1.bf16.msra.mxu0 %v1764_v12  ;;  %v1889_v5 = vld [vmem:[#allocation3 + $0x74] ss:$8 sps:$4 sm:$0xff]   ;;  %v1807_v6 = vld [vmem:[#allocation3 + $0x224] ss:$8 sps:$4 sm:$0xff]   ;;  %v1805_v7 = vld [vmem:[#allocation3 + $0x220] ss:$8 sps:$4 sm:$0xff]  }
  0x38   :  { %934 = vmatprep.subr.bf16.mxu0 %v1765_v13  ;;  %888 = vmatpush1.bf16.msra.mxu1 %v1861_v44  ;;  %v1891_v8 = vld [vmem:[#allocation3 + $0x70] ss:$8 sps:$4 sm:$0xff]   ;;  %v1895_v9 = vld [vmem:[#allocation3 + $0x84] ss:$8 sps:$4 sm:$0xff]   ;;  %v1810_v10 = vld [vmem:[#allocation3 + $0x234] ss:$8 sps:$4 sm:$0xff]  }
  0x39   :  { %889 = vmatprep.subr.bf16.mxu1 %v1865_v47  ;;  %v1808_v11 = vld [vmem:[#allocation3 + $0x230] ss:$8 sps:$4 sm:$0xff]   ;;  %v1897_v12 = vld [vmem:[#allocation3 + $0x80] ss:$8 sps:$4 sm:$0xff]   ;;  %v1901_v13 = vld [vmem:[#allocation3 + $0x94] ss:$8 sps:$4 sm:$0xff]  }
  0x3a   :  { %v1813_v14 = vld [vmem:[#allocation3 + $0x244] ss:$8 sps:$4 sm:$0xff]   ;;  %v1816_v20 = vld [vmem:[#allocation3 + $0x254] ss:$8 sps:$4 sm:$0xff]   ;;  %v1933_v37 = vld [vmem:[#allocation3 + $0xe0] ss:$8 sps:$4 sm:$0xff]  }
  0x3b   :  { %935 = vmatpush1.bf16.msra.mxu0 %v1767_v16  ;;  %v1811_v16 = vld [vmem:[#allocation3 + $0x240] ss:$8 sps:$4 sm:$0xff]   ;;  %v1907_v19 = vld [vmem:[#allocation3 + $0xa4] ss:$8 sps:$4 sm:$0xff]   ;;  %v1913_v23 = vld [vmem:[#allocation3 + $0xb4] ss:$8 sps:$4 sm:$0xff]  }
  0x3c   :  { %936 = vmatprep.subr.bf16.mxu0 %v1768_v17  ;;  %890 = vmatpush1.bf16.msra.mxu1 %v1867_v49  ;;  %v1903_v17 = vld [vmem:[#allocation3 + $0x90] ss:$8 sps:$4 sm:$0xff]   ;;  %v1819_v24 = vld [vmem:[#allocation3 + $0x264] ss:$8 sps:$4 sm:$0xff]   ;;  %v1937_v39 = vld [vmem:[#allocation3 + $0xf4] ss:$8 sps:$4 sm:$0xff]  }
  0x3d   :  { %891 = vmatprep.subr.bf16.mxu1 %v1871_v51  ;;  %v1919_v27 = vld [vmem:[#allocation3 + $0xc4] ss:$8 sps:$4 sm:$0xff]   ;;  %v1834_v44 = vld [vmem:[#allocation3 + $0x2b4] ss:$8 sps:$4 sm:$0xff]   ;;  %v1832_v47 = vld [vmem:[#allocation3 + $0x2b0] ss:$8 sps:$4 sm:$0xff]  }
  0x3e   :  { %v1931_v35 = vld [vmem:[#allocation3 + $0xe4] ss:$8 sps:$4 sm:$0xff]   ;;  %v1949_v49 = vld [vmem:[#allocation5 + $0x14] ss:$8 sps:$4 sm:$0xff]   ;;  %v1950_v57 = vld [vmem:[#allocation5 + $0x20] ss:$8 sps:$4 sm:$0xff]  }
  0x3f   :  { %937 = vmatpush1.bf16.msra.mxu0 %v1770_v21  ;;  %v1814_v21 = vld [vmem:[#allocation3 + $0x250] ss:$8 sps:$4 sm:$0xff]   ;;  %v1831_v40 = vld [vmem:[#allocation3 + $0x2a4] ss:$8 sps:$4 sm:$0xff]   ;;  %v1840_v56 = vld [vmem:[#allocation3 + $0x2d4] ss:$8 sps:$4 sm:$0xff]  }
  0x40   :  { %938 = vmatprep.subr.bf16.mxu0 %v1771_v22  ;;  %892 = vmatpush1.bf16.msra.mxu1 %v1873_v55  ;;  %v1909_v22 = vld [vmem:[#allocation3 + $0xa0] ss:$8 sps:$4 sm:$0xff]   ;;  %v1946_v43 = vld [vmem:[#allocation5 + $0x4] ss:$8 sps:$4 sm:$0xff]  }
  0x41   :  { %893 = vmatprep.subr.bf16.mxu1 %v1877_v58  ;;  %v1837_v51 = vld [vmem:[#allocation3 + $0x2c4] ss:$8 sps:$4 sm:$0xff]   ;;  %v1838_v58 = vld [vmem:[#allocation3 + $0x2d0] ss:$8 sps:$4 sm:$0xff]  }
  0x42   :  { %v1952_v55 = vld [vmem:[#allocation5 + $0x24] ss:$8 sps:$4 sm:$0xff]  }
  0x43   :  { %939 = vmatpush1.bf16.msra.mxu0 %v1773_v25  ;;  %v1817_v25 = vld [vmem:[#allocation3 + $0x260] ss:$8 sps:$4 sm:$0xff]   ;;  %v1843_v60 = vld [vmem:[#allocation3 + $0x2e4] ss:$8 sps:$4 sm:$0xff]  }
  0x44   :  { %940 = vmatprep.subr.bf16.mxu0 %v1774_v26  ;;  %894 = vmatpush1.bf16.msra.mxu1 %v1879_v62  ;;  %v1915_v26 = vld [vmem:[#allocation3 + $0xb0] ss:$8 sps:$4 sm:$0xff]   ;;  %v1841_v62 = vld [vmem:[#allocation3 + $0x2e0] ss:$8 sps:$4 sm:$0xff]  }
  0x45   :  { %895 = vmatprep.subr.bf16.mxu1 %v1883_v2  ;;  %v1956_v2 = vld [vmem:[#allocation5 + $0x40] ss:$8 sps:$4 sm:$0xff]  }
  0x47   :  { %941 = vmatpush1.bf16.msra.mxu0 %v1776_v28  ;;  %v1822_v28 = vld [vmem:[#allocation3 + $0x274] ss:$8 sps:$4 sm:$0xff]  }
  0x48   :  { %942 = vmatprep.subr.bf16.mxu0 %v1777_v29  ;;  %896 = vmatpush1.bf16.msra.mxu1 %v1885_v4  ;;  %v1820_v29 = vld [vmem:[#allocation3 + $0x270] ss:$8 sps:$4 sm:$0xff]   ;;  %v1961_v4 = vld [vmem:[#allocation5 + $0x54] ss:$8 sps:$4 sm:$0xff]  }
  0x49   :  { %897 = vmatprep.subr.bf16.mxu1 %v1889_v5  ;;  %v1852_v5 = vld [vmem:[#allocation3 + $0x304] ss:$8 sps:$4 sm:$0xff]  }
  0x4b   :  { %943 = vmatpush1.bf16.msra.mxu0 %v1779_v30  ;;  %v1921_v30 = vld [vmem:[#allocation3 + $0xc0] ss:$8 sps:$4 sm:$0xff]  }
  0x4c   :  { %944 = vmatprep.subr.bf16.mxu0 %v1780_v31  ;;  %898 = vmatpush1.bf16.msra.mxu1 %v1891_v8  ;;  %v1925_v31 = vld [vmem:[#allocation3 + $0xd4] ss:$8 sps:$4 sm:$0xff]   ;;  %v1850_v8 = vld [vmem:[#allocation3 + $0x300] ss:$8 sps:$4 sm:$0xff]  }
  0x4d   :  { %899 = vmatprep.subr.bf16.mxu1 %v1895_v9 }
  0x4f   :  { %945 = vmatpush1.bf16.msra.mxu0 %v1782_v32  ;;  %v1825_v32 = vld [vmem:[#allocation3 + $0x284] ss:$8 sps:$4 sm:$0xff]  }
  0x50   :  { %946 = vmatprep.subr.bf16.mxu0 %v1783_v33  ;;  %900 = vmatpush1.bf16.msra.mxu1 %v1897_v12  ;;  %v1823_v33 = vld [vmem:[#allocation3 + $0x280] ss:$8 sps:$4 sm:$0xff]  }
  0x51   :  { %901 = vmatprep.subr.bf16.mxu1 %v1901_v13  ;;  %v1962_v12 = vld [vmem:[#allocation5 + $0x60] ss:$8 sps:$4 sm:$0xff]   ;;  %v1856_v13 = vld [vmem:[#allocation3 + $0x310] ss:$8 sps:$4 sm:$0xff]  }
  0x53   :  { %947 = vmatpush1.bf16.msra.mxu0 %v1785_v34  ;;  %v1927_v34 = vld [vmem:[#allocation3 + $0xd0] ss:$8 sps:$4 sm:$0xff]  }
  0x54   :  { %948 = vmatprep.subr.bf16.mxu0 %v1786_v36  ;;  %902 = vmatpush1.bf16.msra.mxu1 %v1903_v17  ;;  %v1828_v36 = vld [vmem:[#allocation3 + $0x294] ss:$8 sps:$4 sm:$0xff]   ;;  %v1862_v17 = vld [vmem:[#allocation3 + $0x320] ss:$8 sps:$4 sm:$0xff]  }
  0x55   :  { %903 = vmatprep.subr.bf16.mxu1 %v1907_v19  ;;  %v1870_v19 = vld [vmem:[#allocation3 + $0x334] ss:$8 sps:$4 sm:$0xff]  }
  0x57   :  { %949 = vmatpush1.bf16.msra.mxu0 %v1788_v38  ;;  %v1826_v38 = vld [vmem:[#allocation3 + $0x290] ss:$8 sps:$4 sm:$0xff]  }
  0x58   :  { %950 = vmatprep.subr.bf16.mxu0 %v1789_v41  ;;  %904 = vmatpush1.bf16.msra.mxu1 %v1909_v22  ;;  %v1939_v41 = vld [vmem:[#allocation3 + $0xf0] ss:$8 sps:$4 sm:$0xff]   ;;  %v1874_v22 = vld [vmem:[#allocation3 + $0x340] ss:$8 sps:$4 sm:$0xff]  }
  0x59   :  { %905 = vmatprep.subr.bf16.mxu1 %v1913_v23  ;;  %v1882_v23 = vld [vmem:[#allocation3 + $0x354] ss:$8 sps:$4 sm:$0xff]  }
  0x5b   :  { %951 = vmatpush1.bf16.msra.mxu0 %v1791_v42  ;;  %v1829_v42 = vld [vmem:[#allocation3 + $0x2a0] ss:$8 sps:$4 sm:$0xff]  }
  0x5c   :  { %952 = vmatprep.subr.bf16.mxu0 %v1792_v45  ;;  %906 = vmatpush1.bf16.msra.mxu1 %v1915_v26  ;;  %v1944_v45 = vld [vmem:[#allocation5] ss:$8 sps:$4 sm:$0xff]  }
  0x5d   :  { %907 = vmatprep.subr.bf16.mxu1 %v1919_v27  ;;  %v1886_v26 = vld [vmem:[#allocation3 + $0x360] ss:$8 sps:$4 sm:$0xff]   ;;  %v1894_v27 = vld [vmem:[#allocation3 + $0x374] ss:$8 sps:$4 sm:$0xff]  }
  0x5f   :  { %953 = vmatpush1.bf16.msra.mxu0 %v1794_v48  ;;  %v107_v48 = vpack.c.bf16 %v2149_v53, %v2149_v53  ;;  %v82_v53 = vcombine.high %v2142_v46, %v2142_v46 }
  0x60   :  { %954 = vmatprep.subr.bf16.mxu0 %v1795_v52  ;;  %908 = vmatpush1.bf16.msra.mxu1 %v1921_v30  ;;  %v1947_v52 = vld [vmem:[#allocation5 + $0x10] ss:$8 sps:$4 sm:$0xff]   ;;  %v1898_v30 = vld [vmem:[#allocation3 + $0x380] ss:$8 sps:$4 sm:$0xff]  }
  0x61   :  { %909 = vmatprep.subr.bf16.mxu1 %v1925_v31  ;;  %v1906_v31 = vld [vmem:[#allocation3 + $0x394] ss:$8 sps:$4 sm:$0xff]  }
  0x63   :  { %955 = vmatpush1.bf16.msra.mxu0 %v1797_v54  ;;  %v1835_v54 = vld [vmem:[#allocation3 + $0x2c0] ss:$8 sps:$4 sm:$0xff]  }
  0x64   :  { %965 = vmatprep.subr.bf16.mxu0 %v1801_v59  ;;  %910 = vmatpush1.bf16.msra.mxu1 %v1927_v34  ;;  %v1955_v59 = vld [vmem:[#allocation5 + $0x34] ss:$8 sps:$4 sm:$0xff]   ;;  %v1910_v34 = vld [vmem:[#allocation3 + $0x3a0] ss:$8 sps:$4 sm:$0xff]  }
  0x65   :  { %911 = vmatprep.subr.bf16.mxu1 %v1931_v35  ;;  %v1918_v35 = vld [vmem:[#allocation3 + $0x3b4] ss:$8 sps:$4 sm:$0xff]  }
  0x66   :  { %957 = vmatmul.mubr.bf16.vlgmr.msra.gmra.mrb[0].mxu0 %v109_v61  ;;  %v1953_v61 = vld [vmem:[#allocation5 + $0x30] ss:$8 sps:$4 sm:$0xff]  }
  0x67   :  { %966 = vmatpush1.bf16.msra.mxu0 %v1799_v63  ;;  %997 = vmatprep.mubr.bf16.mxu0 %v112_v0  ;;  %v2162_v63 = vrot.slane %v82_v53, %v2129_v18  ;;  %v1958_v0 = vld [vmem:[#allocation5 + $0x44] ss:$8 sps:$4 sm:$0xff]   ;;  %v1980_v53 = vld [vmem:[#allocation5 + $0xc0] ss:$8 sps:$4 sm:$0xff]  }
  0x68   :  { %967 = vmatprep.subr.bf16.mxu0 %v1804_v1  ;;  %912 = vmatpush1.bf16.msra.mxu1 %v1933_v37  ;;  %v1846_v1 = vld [vmem:[#allocation3 + $0x2f4] ss:$8 sps:$4 sm:$0xff]   ;;  %v1924_v37 = vld [vmem:[#allocation3 + $0x3c4] ss:$8 sps:$4 sm:$0xff]  }
  0x69   :  { %913 = vmatprep.subr.bf16.mxu1 %v1937_v39  ;;  %v98_v46 = vcombine.high %v2162_v63, %v2162_v63  ;;  %v1930_v39 = vld [vmem:[#allocation3 + $0x3d4] ss:$8 sps:$4 sm:$0xff]  }
  0x6b   :  { %968 = vmatpush1.bf16.msra.mxu0 %v1802_v3  ;;  %v1844_v3 = vld [vmem:[#allocation3 + $0x2f0] ss:$8 sps:$4 sm:$0xff]   ;;  %v114_v9 = vpack.c.bf16 %v98_v46, %v98_v46 }
  0x6c   :  { %969 = vmatprep.subr.bf16.mxu0 %v1807_v6  ;;  %914 = vmatpush1.bf16.msra.mxu1 %v1939_v41  ;;  %v111_v6 = vpack.c.bf16 %v2146_v50, %v2146_v50  ;;  %v1965_v50 = vld [vmem:[#allocation5 + $0x70] ss:$8 sps:$4 sm:$0xff]   ;;  %v1936_v41 = vld [vmem:[#allocation3 + $0x3e4] ss:$8 sps:$4 sm:$0xff]  }
  0x6d   :  { %1304 = vmatprep.subr.bf16.mxu1 %v1946_v43  ;;  %v1942_v43 = vld [vmem:[#allocation3 + $0x3f4] ss:$8 sps:$4 sm:$0xff]  }
  0x6f   :  { %970 = vmatpush1.bf16.msra.mxu0 %v1805_v7  ;;  %916 = vmatmul.mubr.bf16.vlgmr.msra.gmra.mrb[0].mxu1 %v107_v48  ;;  %v1959_v7 = vld [vmem:[#allocation5 + $0x50] ss:$8 sps:$4 sm:$0xff]   ;;  %v1970_v48 = vld [vmem:[#allocation5 + $0x84] ss:$8 sps:$4 sm:$0xff]  }
  0x70   :  { %971 = vmatprep.subr.bf16.mxu0 %v1810_v10  ;;  %1305 = vmatpush1.bf16.msra.mxu1 %v1944_v45  ;;  %v1858_v10 = vld [vmem:[#allocation3 + $0x314] ss:$8 sps:$4 sm:$0xff]   ;;  %v113_v45 = vpack.c.bf16 %v2162_v63, %v2162_v63 }
  0x71   :  { %1306 = vmatprep.subr.bf16.mxu1 %v1949_v49  ;;  %v2061_v49 = vmov 0.0   ;;  %v1991_v63 = vld [vmem:[#allocation5 + $0xf4] ss:$8 sps:$4 sm:$0xff]  }
  0x72   :  { %59 = vst [vmem:[#allocation2] sm:$0xf] %v2061_v49 }
  0x73   :  { %972 = vmatpush1.bf16.msra.mxu0 %v1808_v11  ;;  %v1964_v11 = vld [vmem:[#allocation5 + $0x64] ss:$8 sps:$4 sm:$0xff]  }
  0x74   :  { %973 = vmatprep.subr.bf16.mxu0 %v1813_v14  ;;  %1307 = vmatpush1.bf16.msra.mxu1 %v1947_v52  ;;  %v1967_v14 = vld [vmem:[#allocation5 + $0x74] ss:$8 sps:$4 sm:$0xff]   ;;  %v1971_v52 = vld [vmem:[#allocation5 + $0x90] ss:$8 sps:$4 sm:$0xff]  }
  0x75   :  { %1308 = vmatprep.subr.bf16.mxu1 %v1952_v55  ;;  %v1974_v55 = vld [vmem:[#allocation5 + $0xa0] ss:$8 sps:$4 sm:$0xff]  }
  0x77   :  { %974 = vmatpush1.bf16.msra.mxu0 %v1811_v16  ;;  %v1864_v16 = vld [vmem:[#allocation3 + $0x324] ss:$8 sps:$4 sm:$0xff]  }
  0x78   :  { %975 = vmatprep.subr.bf16.mxu0 %v1816_v20  ;;  %1309 = vmatpush1.bf16.msra.mxu1 %v1950_v57  ;;  %v1868_v20 = vld [vmem:[#allocation3 + $0x330] ss:$8 sps:$4 sm:$0xff]  }
  0x79   :  { %1310 = vmatprep.subr.bf16.mxu1 %v1955_v59  ;;  %v1977_v57 = vld [vmem:[#allocation5 + $0xb0] ss:$8 sps:$4 sm:$0xff]   ;;  %v1985_v59 = vld [vmem:[#allocation5 + $0xd4] ss:$8 sps:$4 sm:$0xff]  }
  0x7b   :  { %976 = vmatpush1.bf16.msra.mxu0 %v1814_v21  ;;  %v1876_v21 = vld [vmem:[#allocation3 + $0x344] ss:$8 sps:$4 sm:$0xff]  }
  0x7c   :  { %977 = vmatprep.subr.bf16.mxu0 %v1819_v24  ;;  %1311 = vmatpush1.bf16.msra.mxu1 %v1953_v61  ;;  %v1880_v24 = vld [vmem:[#allocation3 + $0x350] ss:$8 sps:$4 sm:$0xff]   ;;  %v1988_v61 = vld [vmem:[#allocation5 + $0xe4] ss:$8 sps:$4 sm:$0xff]  }
  0x7d   :  { %1312 = vmatprep.subr.bf16.mxu1 %v1958_v0  ;;  %v1989_v0 = vld [vmem:[#allocation5 + $0xf0] ss:$8 sps:$4 sm:$0xff]  }
  0x7f   :  { %978 = vmatpush1.bf16.msra.mxu0 %v1817_v25  ;;  %v1888_v25 = vld [vmem:[#allocation3 + $0x364] ss:$8 sps:$4 sm:$0xff]  }
  0x80   :  { %979 = vmatprep.subr.bf16.mxu0 %v1822_v28  ;;  %1313 = vmatpush1.bf16.msra.mxu1 %v1956_v2  ;;  %v1892_v28 = vld [vmem:[#allocation3 + $0x370] ss:$8 sps:$4 sm:$0xff]  }
  0x81   :  { %1314 = vmatprep.subr.bf16.mxu1 %v1961_v4 }
  0x83   :  { %980 = vmatpush1.bf16.msra.mxu0 %v1820_v29  ;;  %v1900_v29 = vld [vmem:[#allocation3 + $0x384] ss:$8 sps:$4 sm:$0xff]  }
  0x84   :  { %981 = vmatprep.subr.bf16.mxu0 %v1825_v32  ;;  %1315 = vmatpush1.bf16.msra.mxu1 %v1959_v7  ;;  %v1904_v32 = vld [vmem:[#allocation3 + $0x390] ss:$8 sps:$4 sm:$0xff]  }
  0x85   :  { %1316 = vmatprep.subr.bf16.mxu1 %v1964_v11  ;;  %v1072_v11 = vsub.s32 1, %v2126_v15 }
  0x87   :  { %982 = vmatpush1.bf16.msra.mxu0 %v1823_v33  ;;  %v1912_v33 = vld [vmem:[#allocation3 + $0x3a4] ss:$8 sps:$4 sm:$0xff]  }
  0x88   :  { %983 = vmatprep.subr.bf16.mxu0 %v1828_v36  ;;  %1317 = vmatpush1.bf16.msra.mxu1 %v1962_v12  ;;  %v1916_v36 = vld [vmem:[#allocation3 + $0x3b0] ss:$8 sps:$4 sm:$0xff]  }
  0x89   :  { %1318 = vmatprep.subr.bf16.mxu1 %v1967_v14 }
  0x8b   :  { %984 = vmatpush1.bf16.msra.mxu0 %v1826_v38  ;;  %v1922_v38 = vld [vmem:[#allocation3 + $0x3c0] ss:$8 sps:$4 sm:$0xff]  }
  0x8c   :  { %985 = vmatprep.subr.bf16.mxu0 %v1831_v40  ;;  %1319 = vmatpush1.bf16.msra.mxu1 %v1965_v50  ;;  %v1928_v40 = vld [vmem:[#allocation3 + $0x3d0] ss:$8 sps:$4 sm:$0xff]  }
  0x8d   :  { %1320 = vmatprep.subr.bf16.mxu1 %v1970_v48 }
  0x8f   :  { %986 = vmatpush1.bf16.msra.mxu0 %v1829_v42  ;;  %v1934_v42 = vld [vmem:[#allocation3 + $0x3e0] ss:$8 sps:$4 sm:$0xff]  }
  0x90   :  { %987 = vmatprep.subr.bf16.mxu0 %v1834_v44  ;;  %v1940_v44 = vld [vmem:[#allocation3 + $0x3f0] ss:$8 sps:$4 sm:$0xff]  }
  0x93   :  { %988 = vmatpush1.bf16.msra.mxu0 %v1832_v47  ;;  %v1968_v47 = vld [vmem:[#allocation5 + $0x80] ss:$8 sps:$4 sm:$0xff]  }
  0x94   :  { %989 = vmatprep.subr.bf16.mxu0 %v1837_v51  ;;  %1321 = vmatpush1.bf16.msra.mxu1 %v1968_v47  ;;  %v1973_v51 = vld [vmem:[#allocation5 + $0x94] ss:$8 sps:$4 sm:$0xff]  }
  0x95   :  { %1322 = vmatprep.subr.bf16.mxu1 %v1973_v51 }
  0x97   :  { %990 = vmatpush1.bf16.msra.mxu0 %v1835_v54  ;;  %v1976_v54 = vld [vmem:[#allocation5 + $0xa4] ss:$8 sps:$4 sm:$0xff]  }
  0x98   :  { %991 = vmatprep.subr.bf16.mxu0 %v1840_v56  ;;  %1323 = vmatpush1.bf16.msra.mxu1 %v1971_v52  ;;  %v1979_v56 = vld [vmem:[#allocation5 + $0xb4] ss:$8 sps:$4 sm:$0xff]  }
  0x99   :  { %1324 = vmatprep.subr.bf16.mxu1 %v1976_v54 }
  0x9b   :  { %992 = vmatpush1.bf16.msra.mxu0 %v1838_v58  ;;  %v1982_v58 = vld [vmem:[#allocation5 + $0xc4] ss:$8 sps:$4 sm:$0xff]  }
  0x9c   :  { %993 = vmatprep.subr.bf16.mxu0 %v1843_v60  ;;  %1325 = vmatpush1.bf16.msra.mxu1 %v1974_v55  ;;  %v1983_v60 = vld [vmem:[#allocation5 + $0xd0] ss:$8 sps:$4 sm:$0xff]  }
  0x9d   :  { %1326 = vmatprep.subr.bf16.mxu1 %v1979_v56 }
  0x9f   :  { %994 = vmatpush1.bf16.msra.mxu0 %v1841_v62  ;;  %v1986_v62 = vld [vmem:[#allocation5 + $0xe0] ss:$8 sps:$4 sm:$0xff]  }
  0xa0   :  { %995 = vmatprep.subr.bf16.mxu0 %v1846_v1  ;;  %1327 = vmatpush1.bf16.msra.mxu1 %v1977_v57  ;;  %v1992_v1 = vld [vmem:[%s2240_s5 + $0x40] sm:$0xff]  }
  0xa1   :  { %1328 = vmatprep.subr.bf16.mxu1 %v1982_v58 }
  0xa3   :  { %996 = vmatpush1.bf16.msra.mxu0 %v1844_v3 }
  0xa4   :  { %1006 = vmatprep.subr.bf16.mxu0 %v1852_v5  ;;  %1329 = vmatpush1.bf16.msra.mxu1 %v1980_v53 }
  0xa5   :  { %1330 = vmatprep.subr.bf16.mxu1 %v1985_v59 }
  0xa6   :  { %998 = vmatmul.mubr.bf16.vlgmr.msra.gmra.mrb[0].mxu0 %v111_v6 }
  0xa7   :  { %1007 = vmatpush1.bf16.msra.mxu0 %v1850_v8  ;;  %1038 = vmatprep.mubr.bf16.mxu0 %v114_v9 }
  0xa8   :  { %1008 = vmatprep.subr.bf16.mxu0 %v1858_v10  ;;  %1331 = vmatpush1.bf16.msra.mxu1 %v1983_v60  ;;  %v1068_v10 = vsub.s32 0, %v2126_v15 }
  0xa9   :  { %1332 = vmatprep.subr.bf16.mxu1 %v1988_v61 }
  0xab   :  { %1009 = vmatpush1.bf16.msra.mxu0 %v1856_v13  ;;  %v1064_v13 = vld [vmem:[%s2237_s2] sm:$0x3] }
  0xac   :  { %1010 = vmatprep.subr.bf16.mxu0 %v1864_v16  ;;  %1333 = vmatpush1.bf16.msra.mxu1 %v1986_v62  ;;  %v60_v16 = vld [vmem:[#allocation2] sm:$0xf] }
  0xad   :  { %1334 = vmatprep.subr.bf16.mxu1 %v1991_v63  ;;  %v1695_v62 = vld [vmem:[%s2241_s6] ss:$0 sm:$0xff] }
  0xaf   :  { %1011 = vmatpush1.bf16.msra.mxu0 %v1862_v17  ;;  %v1069_v17 = vrot.slane %v1064_v13, %v1068_v10 }
  0xb0   :  { %1012 = vmatprep.subr.bf16.mxu0 %v1870_v19  ;;  %1335 = vmatpush1.bf16.msra.mxu1 %v1989_v0  ;;  %v1073_v19 = vrot.slane %v1064_v13, %v1072_v11 }
  0xb1   :  { %1712 = vmatprep.subr.bf16.mxu1 %v1992_v1 }
  0xb3   :  { %1013 = vmatpush1.bf16.msra.mxu0 %v1868_v20 }
  0xb4   :  { %1014 = vmatprep.subr.bf16.mxu0 %v1876_v21  ;;  %v1074_v21 = vcombine.low %v1069_v17, %v1073_v19 }
  0xb7   :  { %1015 = vmatpush1.bf16.msra.mxu0 %v1874_v22  ;;  %v1081_v22 = vrot.slane %v1074_v21, %v2129_v18 }
  0xb8   :  { %1016 = vmatprep.subr.bf16.mxu0 %v1882_v23 }
  0xbb   :  { %1017 = vmatpush1.bf16.msra.mxu0 %v1880_v24 }
  0xbc   :  { %1018 = vmatprep.subr.bf16.mxu0 %v1888_v25 }
  0xbf   :  { %1019 = vmatpush1.bf16.msra.mxu0 %v1886_v26 }
  0xc0   :  { %1020 = vmatprep.subr.bf16.mxu0 %v1894_v27 }
  0xc3   :  { %1021 = vmatpush1.bf16.msra.mxu0 %v1892_v28 }
  0xc4   :  { %1022 = vmatprep.subr.bf16.mxu0 %v1900_v29  ;;  %v1993_v29 = vld [vmem:[%s2240_s5] sm:$0xff]  }
  0xc7   :  { %1023 = vmatpush1.bf16.msra.mxu0 %v1898_v30 }
  0xc8   :  { %1024 = vmatprep.subr.bf16.mxu0 %v1906_v31  ;;  %v1994_v31 = vld [vmem:[%s2240_s5 + $0x48] sm:$0xff]  }
  0xcb   :  { %1025 = vmatpush1.bf16.msra.mxu0 %v1904_v32  ;;  %v1995_v32 = vld [vmem:[%s2240_s5 + $0x8] sm:$0xff]  }
  0xcc   :  { %1026 = vmatprep.subr.bf16.mxu0 %v1912_v33  ;;  %v1997_v33 = vld [vmem:[%s2240_s5 + $0x10] sm:$0xff]  }
  0xcf   :  { %1027 = vmatpush1.bf16.msra.mxu0 %v1910_v34  ;;  %v1998_v34 = vld [vmem:[%s2240_s5 + $0x58] sm:$0xff]  }
  0xd0   :  { %1028 = vmatprep.subr.bf16.mxu0 %v1918_v35  ;;  %v1999_v35 = vld [vmem:[%s2240_s5 + $0x18] sm:$0xff]  }
  0xd3   :  { %1029 = vmatpush1.bf16.msra.mxu0 %v1916_v36  ;;  %v2000_v36 = vld [vmem:[%s2240_s5 + $0x60] sm:$0xff]  }
  0xd4   :  { %1030 = vmatprep.subr.bf16.mxu0 %v1924_v37  ;;  %v2001_v37 = vld [vmem:[%s2240_s5 + $0x20] sm:$0xff]  }
  0xd7   :  { %1031 = vmatpush1.bf16.msra.mxu0 %v1922_v38  ;;  %v2002_v38 = vld [vmem:[%s2240_s5 + $0x68] sm:$0xff]  }
  0xd8   :  { %1032 = vmatprep.subr.bf16.mxu0 %v1930_v39  ;;  %v2003_v39 = vld [vmem:[%s2240_s5 + $0x28] sm:$0xff]  }
  0xdb   :  { %1033 = vmatpush1.bf16.msra.mxu0 %v1928_v40  ;;  %v2004_v40 = vld [vmem:[%s2240_s5 + $0x70] sm:$0xff]  }
  0xdc   :  { %1034 = vmatprep.subr.bf16.mxu0 %v1936_v41  ;;  %v2005_v41 = vld [vmem:[%s2240_s5 + $0x30] sm:$0xff]  }
  0xdf   :  { %1035 = vmatpush1.bf16.msra.mxu0 %v1934_v42  ;;  %v2006_v42 = vld [vmem:[%s2240_s5 + $0x78] sm:$0xff]  }
  0xe0   :  { %1036 = vmatprep.subr.bf16.mxu0 %v1942_v43  ;;  %v2007_v43 = vld [vmem:[%s2240_s5 + $0x38] sm:$0xff]  }
  0xe3   :  { %1037 = vmatpush1.bf16.msra.mxu0 %v1940_v44  ;;  %v1132_v44 = vld [vmem:[%s2239_s4] sm:$0x3] }
  0xe4   :  { %v1141_v47 = vrot.slane %v1132_v44, %v1072_v11 }
  0xe6   :  { %1039 = vmatmul.mubr.bf16.vlgmr.msra.gmra.mrb[0].mxu0 %v113_v45  ;;  %v1137_v45 = vrot.slane %v1132_v44, %v1068_v10 }
 0x142   :  { %v917_v2 = vpop.f32.mrb[0].mxu1 }
 0x143   :  { %v919_v3 = vpop.f32.mrb[1].mxu1 }
 0x144   :  { %v921_v46 = vpop.f32.mrb[2].mxu1 }
 0x145   :  { %v922_v4 = vpop.f32.mrb[3].mxu1 }
 0x1b9   :  { %v1040_v5 = vpop.f32.mrb[0].mxu0 }
 0x1ba   :  { %v1734_v6 = vadd.f32 %v1040_v5, %v917_v2  ;;  %v1042_v7 = vpop.f32.mrb[1].mxu0 }
 0x1bb   :  { %v1735_v8 = vadd.f32 %v1042_v7, %v919_v3  ;;  %v1044_v9 = vpop.f32.mrb[2].mxu0 }
 0x1bc   :  { %v1045_v12 = vpop.f32.mrb[3].mxu0 }
 0x1bd   :  { %v1049_v14 = vcombine.low %v1734_v6, %v1735_v8 }
 0x1bf   :  { %v1056_v50 = vrot.slane %v1049_v14, %v2129_v18 }
 0x1c1   :  { %v1058_v20 = vadd.f32 %v1056_v50, %v60_v16 }
 0x1c3   :  { %1059 = vst [vmem:[#allocation2] sm:$0xf] %v1058_v20 }
 0x1ca   :  { %v1063_v23 = vld [vmem:[#allocation2] sm:$0xf] }
 0x1cb   :  { %v1083_v24 = vadd.f32 %v1081_v22, %v1063_v23 }
 0x1cd   :  { %vm1084_vm0 = vcmp.gt.f32.partialorder %v1083_v24, 0.0  ;;  %v1085_v15 = vmul.f32 0.1, %v1083_v24 }
 0x1cf   :  { %v1086_v25 = vsel %vm1084_vm0, %v1083_v24, %v1085_v15 }
 0x1d0   :  { %v1094_v26 = vrot.slane %v1086_v25, %v2129_v18  ;;  %v1996_v18 = vld [vmem:[%s2240_s5 + $0x50] sm:$0xff]  }
 0x1d2   :  { %v1095_v27 = vcombine.high %v1094_v26, %v1094_v26  ;;  %v1098_v30 = vpack.c.bf16 %v1094_v26, %v1094_v26 }
 0x1d4   :  { %v1099_v28 = vpack.c.bf16 %v1095_v27, %v1095_v27 }
 0x1d6   :  { %1336 = vmatprep.mubr.bf16.mxu1 %v1099_v28 }
 0x1d7   :  { %1337 = vmatmul.mubr.bf16.vlgmr.msra.gmra.mrb[4].mxu1 %v1098_v30 }
 0x1d8   :  { %1713 = vmatpush3.bf16.msra.mxu1 %v1993_v29 }
 0x1d9   :  { %1714 = vmatprep.subr.bf16.mxu1 %v1994_v31 }
 0x1dc   :  { %1715 = vmatpush3.bf16.msra.mxu1 %v1995_v32 }
 0x1dd   :  { %1716 = vmatprep.subr.bf16.mxu1 %v1996_v18 }
 0x1e0   :  { %1717 = vmatpush3.bf16.msra.mxu1 %v1997_v33 }
 0x1e1   :  { %1718 = vmatprep.subr.bf16.mxu1 %v1998_v34 }
 0x1e4   :  { %1719 = vmatpush3.bf16.msra.mxu1 %v1999_v35 }
 0x1e5   :  { %1720 = vmatprep.subr.bf16.mxu1 %v2000_v36 }
 0x1e8   :  { %1721 = vmatpush3.bf16.msra.mxu1 %v2001_v37 }
 0x1e9   :  { %1722 = vmatprep.subr.bf16.mxu1 %v2002_v38 }
 0x1ec   :  { %1723 = vmatpush3.bf16.msra.mxu1 %v2003_v39 }
 0x1ed   :  { %1724 = vmatprep.subr.bf16.mxu1 %v2004_v40 }
 0x1f0   :  { %1725 = vmatpush3.bf16.msra.mxu1 %v2005_v41 }
 0x1f1   :  { %1726 = vmatprep.subr.bf16.mxu1 %v2006_v42 }
 0x1f4   :  { %1727 = vmatpush3.bf16.msra.mxu1 %v2007_v43 }
 0x2aa   :  { %v1338_v48 = vpop.f32.mrb[4].mxu1 }
 0x2ab   :  { %v1339_v49 = vadd.f32 %v1338_v48, %v1137_v45  ;;  %v1340_v51 = vpop.f32.mrb[5].mxu1 }
 0x2ac   :  { %v1341_v52 = vadd.f32 %v1340_v51, %v1141_v47  ;;  %v1342_v54 = vpop.f32.mrb[6].mxu1 }
 0x2ad   :  { %vm1345_vm1 = vcmp.gt.f32.partialorder %v1339_v49, 0.0  ;;  %v1347_v55 = vmul.f32 0.1, %v1339_v49  ;;  %v1343_v56 = vpop.f32.mrb[7].mxu1 }
 0x2ae   :  { %vm1346_vm2 = vcmp.gt.f32.partialorder %v1341_v52, 0.0  ;;  %v1348_v57 = vmul.f32 0.1, %v1341_v52 }
 0x2af   :  { %v1349_v58 = vsel %vm1345_vm1, %v1339_v49, %v1347_v55 }
 0x2b0   :  { %v1350_v53 = vsel %vm1346_vm2, %v1341_v52, %v1348_v57  ;;  %v1351_v60 = vpack.c.bf16 %v1349_v58, %v1349_v58 }
 0x2b1   :  { %v1352_v59 = vpack.c.bf16 %v1350_v53, %v1350_v53 }
 0x2b3   :  { %1520 = vmatprep.mubr.bf16.mxu1 %v1352_v59 }
 0x2b4   :  { %1521 = vmatmul.mubr.bf16.vlgmr.msra.gmra.mrb[8].mxu1 %v1351_v60 }
 0x387   :  { %v1728_v61 = vpop.f32.mrb[8].mxu1 }
 0x388   :  { %v1729_v63 = vpop.f32.mrb[9].mxu1 }
 0x389   :  { %v1730_v0 = vadd.f32 %v1729_v63, %v1728_v61  ;;  %v1731_v1 = vpop.f32.mrb[10].mxu1 }
 0x38a   :  { %v1732_v2 = vpop.f32.mrb[11].mxu1 }
 0x38b   :  { %v1523_v3 = vadd.f32 %v1730_v0, %v1695_v62 }
 0x38d   :  { %1528 = vst [vmem:[%s2242_s7] sm:$0x3] %v1523_v3 }
 0x38e   :  { %1533 = vsyncpa [#allocation4], 1 }
 0x38f   :  { %1534 = vsyncpa [#allocation6], 1 }

</bundles_post_ra>
